<compile_context>
chip_gen: v7x
topology: tpu7x:2x2x1
jax: 0.10.0
libtpu: 0.0.40
codegen_flags: <defaults>
</compile_context>

<pallas_src>
import functools

import jax
import jax.numpy as jnp
from jax.experimental import pallas as pl
from jax.experimental.pallas import tpu as pltpu

_LANES = 128
_NCHAN = 5  # channels: value sq-err, prob bce, crash bce, conf sq-err, fp indicator


def _jetx_loss_kernel(v_ref, p_ref, c_ref, cf_ref, t_ref, out_ref, acc_ref, *,
                      threshold, crash_weight, block_rows):
    i = pl.program_id(1)

    @pl.when(i == 0)
    def _init():
        acc_ref[...] = jnp.zeros_like(acc_ref)

    v = v_ref[...]       # (block_rows, 128) f32
    p = p_ref[...]
    c = c_ref[...]
    cf = cf_ref[...]
    t = t_ref[...]

    thr = jnp.float32(threshold)
    t_lt = t < thr                        # crash target == 1
    t_ge = jnp.logical_not(t_lt)          # threshold target == 1

    # ---- value MSE term ----
    diff = v - t
    sq_err = diff * diff

    # ---- false-positive indicator (value >= thr while target < thr) ----
    fp_ind = jnp.where(jnp.logical_and(v >= thr, t_lt),
                       jnp.float32(1.0), jnp.float32(0.0))

    # ---- BCE with binary targets: one log per element; log clamped at -100
    #      to match torch.nn.BCELoss ----
    sel_p = jnp.where(t_ge, p, 1.0 - p)
    prob_bce = -jnp.maximum(jnp.log(sel_p), -100.0)

    sel_c = jnp.where(t_lt, c, 1.0 - c)
    cw = jnp.where(t_lt, jnp.float32(crash_weight), jnp.float32(1.0))
    crash_bce = -jnp.maximum(jnp.log(sel_c), -100.0) * cw

    # ---- confidence MSE vs. prediction accuracy (detached in torch;
    #      forward-only here, so the value is identical) ----
    pred_acc = 1.0 - jnp.abs(diff) / jnp.maximum(t, 0.1)
    cdiff = cf - pred_acc
    conf_sq = cdiff * cdiff

    # Fold the (block_rows, 128) contribution down to (8, 128) with pure
    # elementwise VPU adds (no cross-lane work), then one small accumulator
    # update per channel.  The (8,128)-tile layout is preserved by the
    # reshape, so no VMEM copy is materialized.
    groups = block_rows // 8

    def fold(x):
        if groups == 1:
            return x
        return jnp.sum(x.reshape(groups, 8, _LANES), axis=0)

    acc_ref[0] += fold(sq_err)
    acc_ref[1] += fold(prob_bce)
    acc_ref[2] += fold(crash_bce)
    acc_ref[3] += fold(conf_sq)
    acc_ref[4] += fold(fp_ind)

    @pl.when(i == pl.num_programs(1) - 1)
    def _finalize():
        out_ref[0] = acc_ref[...]         # per-slice (5, 8, 128) partial sums


def jetx_lstm_loss(predictions, targets, *, threshold=1.5, crash_weight=10.0,
                   alpha=0.6, false_positive_penalty=15.0,
                   max_block_rows=1024, num_slices=2):
    """predictions: dict with 'value','probability','crash_risk','confidence',
    each [B, 1] (or [B]); targets: [B]. Returns scalar f32 loss."""
    def flat(x):
        x = jnp.asarray(x)
        if x.ndim > 1:
            x = jnp.squeeze(x, axis=-1)
        return x.reshape(-1).astype(jnp.float32)

    v = flat(predictions['value'])
    p = flat(predictions['probability'])
    c = flat(predictions['crash_risk'])
    cf = flat(predictions['confidence'])
    t = flat(targets)
    B = t.shape[0]

    # Lane-dense (rows, 128) layout; block rows adapt to the batch size.
    rows_needed = -(-B // _LANES)                         # cdiv
    br = min(int(max_block_rows), ((rows_needed + 7) // 8) * 8)
    br = max(8, (br // 8) * 8)                            # multiple of 8 sublanes
    slice_rows = br * num_slices
    rows_padded = ((rows_needed + slice_rows - 1) // slice_rows) * slice_rows
    n_pad = rows_padded * _LANES
    n_blocks = rows_padded // br
    n_inner = n_blocks // num_slices

    # Zero-contribution padding values (so no in-kernel mask is needed):
    #   t_pad >= threshold and v_pad == t_pad -> sq_err == 0, no false positive
    #   p_pad  = 1.0 -> -log(p)     == 0  (threshold target is 1)
    #   c_pad  = 0.0 -> -log(1 - c) == 0  (crash target is 0)
    #   cf_pad = 1.0 -> (cf - pred_acc)^2 == 0 since pred_acc == 1
    t_pad_val = float(threshold) + 1.0

    def to2d(x, fill):
        if n_pad > B:
            x = jnp.pad(x, (0, n_pad - B), constant_values=float(fill))
        return x.reshape(rows_padded, _LANES)

    v2 = to2d(v, t_pad_val)
    p2 = to2d(p, 1.0)
    c2 = to2d(c, 0.0)
    cf2 = to2d(cf, 1.0)
    t2 = to2d(t, t_pad_val)

    kernel = functools.partial(
        _jetx_loss_kernel,
        threshold=float(threshold),
        crash_weight=float(crash_weight),
        block_rows=br,
    )

    in_spec = pl.BlockSpec((br, _LANES), lambda o, i: (o * n_inner + i, 0))

    partials = pl.pallas_call(
        kernel,
        out_shape=jax.ShapeDtypeStruct((num_slices, _NCHAN, 8, _LANES),
                                       jnp.float32),
        grid_spec=pltpu.PrefetchScalarGridSpec(
            num_scalar_prefetch=0,
            grid=(num_slices, n_inner),
            in_specs=[in_spec] * 5,
            out_specs=pl.BlockSpec((1, _NCHAN, 8, _LANES),
                                   lambda o, i: (o, 0, 0, 0)),
            scratch_shapes=[pltpu.VMEM((_NCHAN, 8, _LANES), jnp.float32)]),
        compiler_params=pltpu.CompilerParams(
            dimension_semantics=("parallel", "arbitrary")),
    )(v2, p2, c2, cf2, t2)

    # Tiny final combine on (num_slices, 5, 8, 128) — negligible vs. the kernel.
    sums = jnp.sum(partials, axis=(0, 2, 3))              # (5,) channel sums
    inv_n = jnp.float32(1.0 / B)
    value_mean = sums[0] * inv_n
    prob_mean = sums[1] * inv_n
    crash_mean = sums[2] * inv_n
    conf_mean = sums[3] * inv_n
    fp_mean = sums[4] * inv_n

    # mean(where(fp, P, 1)) == 1 + (P - 1) * mean(fp)
    penalty_mean = 1.0 + (jnp.float32(false_positive_penalty) - 1.0) * fp_mean
    a = jnp.float32(alpha)
    total = (a * value_mean * penalty_mean
             + (1.0 - a) * 0.5 * prob_mean
             + (1.0 - a) * 0.3 * crash_mean
             + (1.0 - a) * 0.2 * conf_mean)
    return total


def _ref_loss(pred, tgt, threshold=1.5, crash_weight=10.0, alpha=0.6,
              fp_pen=15.0):
    # Pure-JAX reference matching the PyTorch module's forward.
    v = pred['value'].squeeze(-1)
    p = pred['probability'].squeeze(-1)
    c = pred['crash_risk'].squeeze(-1)
    cf = pred['confidence'].squeeze(-1)
    value_loss = jnp.mean((v - tgt) ** 2)
    fp_cond = (v >= threshold) & (tgt < threshold)
    penalized = value_loss * jnp.mean(jnp.where(fp_cond, fp_pen, 1.0))
    tt = (tgt >= threshold).astype(jnp.float32)
    bce = lambda pr, ta: -(ta * jnp.maximum(jnp.log(pr), -100.0)
                           + (1 - ta) * jnp.maximum(jnp.log(1 - pr), -100.0))
    prob_loss = jnp.mean(bce(p, tt))
    ct = (tgt < threshold).astype(jnp.float32)
    cw = jnp.where(ct == 1, crash_weight, 1.0)
    wcl = jnp.mean(cw * bce(c, ct))
    acc = 1.0 - jnp.abs(v - tgt) / jnp.maximum(tgt, 0.1)
    conf_loss = jnp.mean((cf - acc) ** 2)
    return (alpha * penalized + (1 - alpha) * 0.5 * prob_loss
            + (1 - alpha) * 0.3 * wcl + (1 - alpha) * 0.2 * conf_loss)


def _make_inputs(key, B):
    k1, k2, k3, k4, k5 = jax.random.split(key, 5)
    value = 1.0 + jnp.abs(jax.random.normal(k1, (B, 1), jnp.float32))
    probability = jax.nn.sigmoid(jax.random.normal(k2, (B, 1), jnp.float32))
    crash_risk = jax.nn.sigmoid(jax.random.normal(k3, (B, 1), jnp.float32))
    confidence = jax.nn.sigmoid(jax.random.normal(k4, (B, 1), jnp.float32))
    targets = 1.0 + jnp.abs(jax.random.normal(k5, (B,), jnp.float32))
    preds = {'value': value, 'probability': probability,
             'crash_risk': crash_risk, 'confidence': confidence}
    return preds, targets


if __name__ == "__main__":
    key = jax.random.PRNGKey(0)
    ka, kb = jax.random.split(key, 2)

    # Small batch consistent with the module's [B, 1] prediction heads.
    preds_small, tgt_small = _make_inputs(ka, 8)
    loss_small = jetx_lstm_loss(preds_small, tgt_small)
    jax.block_until_ready(loss_small)
    ref_small = _ref_loss(preds_small, tgt_small)
    assert jnp.allclose(loss_small, ref_small, rtol=1e-5, atol=1e-5), (
        loss_small, ref_small)

    # Larger batch with a forced small block to exercise multi-step inner
    # accumulation, the two-slice grid, and the zero-contribution padding.
    preds_big, tgt_big = _make_inputs(kb, 3000)
    loss_big = jetx_lstm_loss(preds_big, tgt_big, max_block_rows=8)
    jax.block_until_ready(loss_big)
    ref_big = _ref_loss(preds_big, tgt_big)
    assert jnp.allclose(loss_big, ref_big, rtol=1e-5, atol=1e-5), (
        loss_big, ref_big)

    # Default (large-block) configuration on the same data.
    loss_big2 = jetx_lstm_loss(preds_big, tgt_big)
    jax.block_until_ready(loss_big2)
    assert jnp.allclose(loss_big2, ref_big, rtol=1e-5, atol=1e-5), (
        loss_big2, ref_big)

    print("KERNEL_OK")
</pallas_src>

<mosaic_0001>
module attributes {stable_mosaic.version = 11 : i64} {
  func.func @_jetx_loss_kernel(%arg0: i32, %arg1: i32, %arg2: memref<8x128xf32, #tpu.memory_space<vmem>>, %arg3: memref<8x128xf32, #tpu.memory_space<vmem>>, %arg4: memref<8x128xf32, #tpu.memory_space<vmem>>, %arg5: memref<8x128xf32, #tpu.memory_space<vmem>>, %arg6: memref<8x128xf32, #tpu.memory_space<vmem>>, %arg7: memref<1x5x8x128xf32, #tpu.memory_space<vmem>>, %arg8: memref<5x8x128xf32, #tpu.memory_space<vmem>>) attributes {dimension_semantics = [#tpu.dimension_semantics<parallel>, #tpu.dimension_semantics<arbitrary>], iteration_bounds = array<i64: 2, 1>, scalar_prefetch = 0 : i64, scratch_operands = 1 : i64, tpu.core_type = #tpu.core_type<tc>, window_params = [{transform_indices = @transform_0, window_bounds = array<i64: 8, 128>}, {transform_indices = @transform_1, window_bounds = array<i64: 8, 128>}, {transform_indices = @transform_2, window_bounds = array<i64: 8, 128>}, {transform_indices = @transform_3, window_bounds = array<i64: 8, 128>}, {transform_indices = @transform_4, window_bounds = array<i64: 8, 128>}, {transform_indices = @transform_5, window_bounds = array<i64: 1, 5, 8, 128>}]} {
    %c0_i32 = arith.constant 0 : i32
    %0 = arith.cmpi eq, %arg1, %c0_i32 : i32
    %1 = arith.extui %0 : i1 to i32
    %c0_i32_0 = arith.constant 0 : i32
    %2 = arith.cmpi ne, %1, %c0_i32_0 : i32
    scf.if %2 {
      %cst_52 = arith.constant 0.000000e+00 : f32
      %80 = vector.broadcast %cst_52 : f32 to vector<5x8x128xf32>
      %c0_53 = arith.constant 0 : index
      %c0_54 = arith.constant 0 : index
      %c0_55 = arith.constant 0 : index
      %81 = vector.load %arg8[%c0_53, %c0_54, %c0_55] : memref<5x8x128xf32, #tpu.memory_space<vmem>>, vector<5x8x128xf32>
      tpu.vector_store %arg8[%c0_53, %c0_54, %c0_55], %80 {strides = array<i32>} : memref<5x8x128xf32, #tpu.memory_space<vmem>>, vector<5x8x128xf32>,
    } else {
    }
    %c0 = arith.constant 0 : index
    %c0_1 = arith.constant 0 : index
    %3 = vector.load %arg2[%c0, %c0_1] : memref<8x128xf32, #tpu.memory_space<vmem>>, vector<8x128xf32>
    %c0_2 = arith.constant 0 : index
    %c0_3 = arith.constant 0 : index
    %4 = vector.load %arg3[%c0_2, %c0_3] : memref<8x128xf32, #tpu.memory_space<vmem>>, vector<8x128xf32>
    %c0_4 = arith.constant 0 : index
    %c0_5 = arith.constant 0 : index
    %5 = vector.load %arg4[%c0_4, %c0_5] : memref<8x128xf32, #tpu.memory_space<vmem>>, vector<8x128xf32>
    %c0_6 = arith.constant 0 : index
    %c0_7 = arith.constant 0 : index
    %6 = vector.load %arg5[%c0_6, %c0_7] : memref<8x128xf32, #tpu.memory_space<vmem>>, vector<8x128xf32>
    %c0_8 = arith.constant 0 : index
    %c0_9 = arith.constant 0 : index
    %7 = vector.load %arg6[%c0_8, %c0_9] : memref<8x128xf32, #tpu.memory_space<vmem>>, vector<8x128xf32>
    %cst = arith.constant 1.500000e+00 : f32
    %8 = vector.broadcast %cst : f32 to vector<8x128xf32>
    %9 = arith.cmpf olt, %7, %8 : vector<8x128xf32>
    %cst_10 = arith.constant dense<true> : vector<8x128xi1>
    %10 = arith.xori %9, %cst_10 : vector<8x128xi1>
    %11 = arith.subf %3, %7 : vector<8x128xf32>
    %12 = arith.mulf %11, %11 : vector<8x128xf32>
    %cst_11 = arith.constant 1.500000e+00 : f32
    %13 = vector.broadcast %cst_11 : f32 to vector<8x128xf32>
    %14 = arith.cmpf oge, %3, %13 : vector<8x128xf32>
    %15 = arith.andi %14, %9 : vector<8x128xi1>
    %cst_12 = arith.constant 1.000000e+00 : f32
    %cst_13 = arith.constant 0.000000e+00 : f32
    %16 = vector.broadcast %cst_12 : f32 to vector<8x128xf32>
    %17 = vector.broadcast %cst_13 : f32 to vector<8x128xf32>
    %18 = arith.select %15, %16, %17 : vector<8x128xi1>, vector<8x128xf32>
    %cst_14 = arith.constant 1.000000e+00 : f32
    %19 = vector.broadcast %cst_14 : f32 to vector<8x128xf32>
    %20 = arith.subf %19, %4 : vector<8x128xf32>
    %21 = arith.select %10, %4, %20 : vector<8x128xi1>, vector<8x128xf32>
    %22 = math.log %21 : vector<8x128xf32>
    %cst_15 = arith.constant -1.000000e+02 : f32
    %23 = vector.broadcast %cst_15 : f32 to vector<8x128xf32>
    %24 = arith.maximumf %22, %23 : vector<8x128xf32>
    %cst_16 = arith.constant 0.000000e+00 : f32
    %25 = vector.broadcast %cst_16 : f32 to vector<8x128xf32>
    %26 = arith.subf %25, %24 : vector<8x128xf32>
    %cst_17 = arith.constant 1.000000e+00 : f32
    %27 = vector.broadcast %cst_17 : f32 to vector<8x128xf32>
    %28 = arith.subf %27, %5 : vector<8x128xf32>
    %29 = arith.select %9, %5, %28 : vector<8x128xi1>, vector<8x128xf32>
    %cst_18 = arith.constant 1.000000e+01 : f32
    %cst_19 = arith.constant 1.000000e+00 : f32
    %30 = vector.broadcast %cst_18 : f32 to vector<8x128xf32>
    %31 = vector.broadcast %cst_19 : f32 to vector<8x128xf32>
    %32 = arith.select %9, %30, %31 : vector<8x128xi1>, vector<8x128xf32>
    %33 = math.log %29 : vector<8x128xf32>
    %cst_20 = arith.constant -1.000000e+02 : f32
    %34 = vector.broadcast %cst_20 : f32 to vector<8x128xf32>
    %35 = arith.maximumf %33, %34 : vector<8x128xf32>
    %cst_21 = arith.constant 0.000000e+00 : f32
    %36 = vector.broadcast %cst_21 : f32 to vector<8x128xf32>
    %37 = arith.subf %36, %35 : vector<8x128xf32>
    %38 = arith.mulf %37, %32 : vector<8x128xf32>
    %39 = math.absf %11 : vector<8x128xf32>
    %cst_22 = arith.constant 1.000000e-01 : f32
    %40 = vector.broadcast %cst_22 : f32 to vector<8x128xf32>
    %41 = arith.maximumf %7, %40 : vector<8x128xf32>
    %42 = arith.divf %39, %41 : vector<8x128xf32>
    %cst_23 = arith.constant 1.000000e+00 : f32
    %43 = vector.broadcast %cst_23 : f32 to vector<8x128xf32>
    %44 = arith.subf %43, %42 : vector<8x128xf32>
    %45 = arith.subf %6, %44 : vector<8x128xf32>
    %46 = arith.mulf %45, %45 : vector<8x128xf32>
    %c0_24 = arith.constant 0 : index
    %c0_25 = arith.constant 0 : index
    %c0_26 = arith.constant 0 : index
    %47 = vector.load %arg8[%c0_24, %c0_25, %c0_26] : memref<5x8x128xf32, #tpu.memory_space<vmem>>, vector<1x8x128xf32>
    %48 = vector.shape_cast %47 : vector<1x8x128xf32> to vector<8x128xf32>
    %49 = arith.addf %48, %12 : vector<8x128xf32>
    %c0_27 = arith.constant 0 : index
    %c0_28 = arith.constant 0 : index
    %c0_29 = arith.constant 0 : index
    %50 = vector.load %arg8[%c0_27, %c0_28, %c0_29] : memref<5x8x128xf32, #tpu.memory_space<vmem>>, vector<1x8x128xf32>
    %51 = vector.shape_cast %50 : vector<1x8x128xf32> to vector<8x128xf32>
    %52 = vector.shape_cast %49 : vector<8x128xf32> to vector<1x8x128xf32>
    tpu.vector_store %arg8[%c0_27, %c0_28, %c0_29], %52 {strides = array<i32>} : memref<5x8x128xf32, #tpu.memory_space<vmem>>, vector<1x8x128xf32>,
    %c1 = arith.constant 1 : index
    %c0_30 = arith.constant 0 : index
    %c0_31 = arith.constant 0 : index
    %53 = vector.load %arg8[%c1, %c0_30, %c0_31] : memref<5x8x128xf32, #tpu.memory_space<vmem>>, vector<1x8x128xf32>
    %54 = vector.shape_cast %53 : vector<1x8x128xf32> to vector<8x128xf32>
    %55 = arith.addf %54, %26 : vector<8x128xf32>
    %c1_32 = arith.constant 1 : index
    %c0_33 = arith.constant 0 : index
    %c0_34 = arith.constant 0 : index
    %56 = vector.load %arg8[%c1_32, %c0_33, %c0_34] : memref<5x8x128xf32, #tpu.memory_space<vmem>>, vector<1x8x128xf32>
    %57 = vector.shape_cast %56 : vector<1x8x128xf32> to vector<8x128xf32>
    %58 = vector.shape_cast %55 : vector<8x128xf32> to vector<1x8x128xf32>
    tpu.vector_store %arg8[%c1_32, %c0_33, %c0_34], %58 {strides = array<i32>} : memref<5x8x128xf32, #tpu.memory_space<vmem>>, vector<1x8x128xf32>,
    %c2 = arith.constant 2 : index
    %c0_35 = arith.constant 0 : index
    %c0_36 = arith.constant 0 : index
    %59 = vector.load %arg8[%c2, %c0_35, %c0_36] : memref<5x8x128xf32, #tpu.memory_space<vmem>>, vector<1x8x128xf32>
    %60 = vector.shape_cast %59 : vector<1x8x128xf32> to vector<8x128xf32>
    %61 = arith.addf %60, %38 : vector<8x128xf32>
    %c2_37 = arith.constant 2 : index
    %c0_38 = arith.constant 0 : index
    %c0_39 = arith.constant 0 : index
    %62 = vector.load %arg8[%c2_37, %c0_38, %c0_39] : memref<5x8x128xf32, #tpu.memory_space<vmem>>, vector<1x8x128xf32>
    %63 = vector.shape_cast %62 : vector<1x8x128xf32> to vector<8x128xf32>
    %64 = vector.shape_cast %61 : vector<8x128xf32> to vector<1x8x128xf32>
    tpu.vector_store %arg8[%c2_37, %c0_38, %c0_39], %64 {strides = array<i32>} : memref<5x8x128xf32, #tpu.memory_space<vmem>>, vector<1x8x128xf32>,
    %c3 = arith.constant 3 : index
    %c0_40 = arith.constant 0 : index
    %c0_41 = arith.constant 0 : index
    %65 = vector.load %arg8[%c3, %c0_40, %c0_41] : memref<5x8x128xf32, #tpu.memory_space<vmem>>, vector<1x8x128xf32>
    %66 = vector.shape_cast %65 : vector<1x8x128xf32> to vector<8x128xf32>
    %67 = arith.addf %66, %46 : vector<8x128xf32>
    %c3_42 = arith.constant 3 : index
    %c0_43 = arith.constant 0 : index
    %c0_44 = arith.constant 0 : index
    %68 = vector.load %arg8[%c3_42, %c0_43, %c0_44] : memref<5x8x128xf32, #tpu.memory_space<vmem>>, vector<1x8x128xf32>
    %69 = vector.shape_cast %68 : vector<1x8x128xf32> to vector<8x128xf32>
    %70 = vector.shape_cast %67 : vector<8x128xf32> to vector<1x8x128xf32>
    tpu.vector_store %arg8[%c3_42, %c0_43, %c0_44], %70 {strides = array<i32>} : memref<5x8x128xf32, #tpu.memory_space<vmem>>, vector<1x8x128xf32>,
    %c4 = arith.constant 4 : index
    %c0_45 = arith.constant 0 : index
    %c0_46 = arith.constant 0 : index
    %71 = vector.load %arg8[%c4, %c0_45, %c0_46] : memref<5x8x128xf32, #tpu.memory_space<vmem>>, vector<1x8x128xf32>
    %72 = vector.shape_cast %71 : vector<1x8x128xf32> to vector<8x128xf32>
    %73 = arith.addf %72, %18 : vector<8x128xf32>
    %c4_47 = arith.constant 4 : index
    %c0_48 = arith.constant 0 : index
    %c0_49 = arith.constant 0 : index
    %74 = vector.load %arg8[%c4_47, %c0_48, %c0_49] : memref<5x8x128xf32, #tpu.memory_space<vmem>>, vector<1x8x128xf32>
    %75 = vector.shape_cast %74 : vector<1x8x128xf32> to vector<8x128xf32>
    %76 = vector.shape_cast %73 : vector<8x128xf32> to vector<1x8x128xf32>
    tpu.vector_store %arg8[%c4_47, %c0_48, %c0_49], %76 {strides = array<i32>} : memref<5x8x128xf32, #tpu.memory_space<vmem>>, vector<1x8x128xf32>,
    %c0_i32_50 = arith.constant 0 : i32
    %77 = arith.cmpi eq, %arg1, %c0_i32_50 : i32
    %78 = arith.extui %77 : i1 to i32
    %c0_i32_51 = arith.constant 0 : i32
    %79 = arith.cmpi ne, %78, %c0_i32_51 : i32
    scf.if %79 {
      %c0_52 = arith.constant 0 : index
      %c0_53 = arith.constant 0 : index
      %c0_54 = arith.constant 0 : index
      %80 = vector.load %arg8[%c0_52, %c0_53, %c0_54] : memref<5x8x128xf32, #tpu.memory_space<vmem>>, vector<5x8x128xf32>
      %c0_55 = arith.constant 0 : index
      %c0_56 = arith.constant 0 : index
      %c0_57 = arith.constant 0 : index
      %c0_58 = arith.constant 0 : index
      %81 = vector.load %arg7[%c0_55, %c0_56, %c0_57, %c0_58] : memref<1x5x8x128xf32, #tpu.memory_space<vmem>>, vector<1x5x8x128xf32>
      %82 = vector.shape_cast %81 : vector<1x5x8x128xf32> to vector<5x8x128xf32>
      %83 = vector.shape_cast %80 : vector<5x8x128xf32> to vector<1x5x8x128xf32>
      tpu.vector_store %arg7[%c0_55, %c0_56, %c0_57, %c0_58], %83 {strides = array<i32>} : memref<1x5x8x128xf32, #tpu.memory_space<vmem>>, vector<1x5x8x128xf32>,
    } else {
    }
    return
  }
  func.func @transform_0(%arg0: i32, %arg1: i32) -> (i32, i32) {
    %c1_i32 = arith.constant 1 : i32
    %0 = arith.muli %arg0, %c1_i32 : i32
    %1 = arith.addi %0, %arg1 : i32
    %c0_i32 = arith.constant 0 : i32
    %c0_i32_0 = arith.constant 0 : i32
    return %1, %c0_i32 : i32, i32
  }
  func.func @transform_1(%arg0: i32, %arg1: i32) -> (i32, i32) {
    %c1_i32 = arith.constant 1 : i32
    %0 = arith.muli %arg0, %c1_i32 : i32
    %1 = arith.addi %0, %arg1 : i32
    %c0_i32 = arith.constant 0 : i32
    %c0_i32_0 = arith.constant 0 : i32
    return %1, %c0_i32 : i32, i32
  }
  func.func @transform_2(%arg0: i32, %arg1: i32) -> (i32, i32) {
    %c1_i32 = arith.constant 1 : i32
    %0 = arith.muli %arg0, %c1_i32 : i32
    %1 = arith.addi %0, %arg1 : i32
    %c0_i32 = arith.constant 0 : i32
    %c0_i32_0 = arith.constant 0 : i32
    return %1, %c0_i32 : i32, i32
  }
  func.func @transform_3(%arg0: i32, %arg1: i32) -> (i32, i32) {
    %c1_i32 = arith.constant 1 : i32
    %0 = arith.muli %arg0, %c1_i32 : i32
    %1 = arith.addi %0, %arg1 : i32
    %c0_i32 = arith.constant 0 : i32
    %c0_i32_0 = arith.constant 0 : i32
    return %1, %c0_i32 : i32, i32
  }
  func.func @transform_4(%arg0: i32, %arg1: i32) -> (i32, i32) {
    %c1_i32 = arith.constant 1 : i32
    %0 = arith.muli %arg0, %c1_i32 : i32
    %1 = arith.addi %0, %arg1 : i32
    %c0_i32 = arith.constant 0 : i32
    %c0_i32_0 = arith.constant 0 : i32
    return %1, %c0_i32 : i32, i32
  }
  func.func @transform_5(%arg0: i32, %arg1: i32) -> (i32, i32, i32, i32) {
    %c0_i32 = arith.constant 0 : i32
    %c0_i32_0 = arith.constant 0 : i32
    %c0_i32_1 = arith.constant 0 : i32
    %c0_i32_2 = arith.constant 0 : i32
    return %arg0, %c0_i32, %c0_i32_0, %c0_i32_1 : i32, i32, i32, i32
  }
}

</mosaic_0001>

<bundles_post_ra>
// kernel: tpu_custom_call.1
= control target key start
LH: loop header
LB: loop body
LE: loop exit
PB: predicated region body
PF: predicated region fallthrough
CT: control target
= control target key end

     0   :  { %s1403_s0 = inlined_call_operand.hbm [shape: f32[16,128], index: 0, kind: input, shape index: {}]   ;;  %s1404_s1 = inlined_call_operand.hbm [shape: f32[16,128], index: 1, kind: input, shape index: {}]   ;;  %s1405_s2 = inlined_call_operand.hbm [shape: f32[16,128], index: 2, kind: input, shape index: {}]   ;;  %s1406_s3 = inlined_call_operand.hbm [shape: f32[16,128], index: 3, kind: input, shape index: {}]   ;;  %s1407_s4 = inlined_call_operand.hbm [shape: f32[16,128], index: 4, kind: input, shape index: {}]   ;;  %s1408_s5 = inlined_call_operand.hbm [shape: f32[2,5,8,128], index: 5, kind: output, shape index: {}]  }
   0x1   :  { %1419 = sst [smem:[#allocation21_spill]] %s1404_s1 }
   0x2   :  { %1420 = sst [smem:[#allocation22_spill]] %s1406_s3 }
   0x3   :  { %10 = vsyncpa [#allocation4], 0 }
   0x4   :  { %12 = vsyncpa [#allocation4 + $0x1], 0 }
   0x5   :  { %13 = vsyncpa [#allocation7], 0 }
   0x6   :  { %15 = vsyncpa [#allocation7 + $0x1], 0 }
   0x7   :  { %16 = vsyncpa [#allocation10], 0 }
   0x8   :  { %18 = vsyncpa [#allocation10 + $0x1], 0 }
   0x9   :  { %19 = vsyncpa [#allocation5], 0 }
   0xa   :  { %21 = vsyncpa [#allocation5 + $0x1], 0  ;;  %s1075_s18 = smov 0   ;;  %s1077_s19 = smov 0  }
   0xb   :  { %s1079_s20 = smov 0   ;;  %s1081_s21 = smov 0  }
   0xc   :  { %s1083_s22 = smov 0   ;;  %s1085_s23 = smov 0  }
   0xd LB: > { %1421 = sst [smem:[#allocation17_spill]] %s1028_s22  ;;  %s1106_s24 = sadd.s32 4294967295, %s1032_s23   ;;  %s1032_s23 = sphi %s1085_s23, %s27_s23   ;;  %s1028_s22 = sphi %s1083_s22, %s1450_s22   ;;  %s1024_s21 = sphi %s1081_s21, %s1449_s21   ;;  %s1020_s20 = sphi %s1079_s20, %s1453_s20   ;;  %s1016_s19 = sphi %s1077_s19, %s1452_s19   ;;  %s1012_s18 = sphi %s1075_s18, %s1451_s18  }
   0xe   : > { %1422 = sst [smem:[#allocation18_spill]] %s1032_s23  ;;  %s675_s25 = sadd.s32 4294967294, %s1032_s23  }
   0xf   : > { %s39_s26 = sadd.s32 1, %s1028_s22  ;;  %s48_s27 = sadd.s32 1, %s1020_s20 }
  0x10   : > { %p41_p0 = scmp.ge.s32.totalorder %s39_s26, 2  ;;  %p55_p1 = scmp.ne.s32.totalorder %s1020_s20, %s1016_s19 }
  0x11   : > { %p56_p2 = scmp.eq.s32.totalorder %s1032_s23, 0  ;;  %p61_p3 = scmp.ne.s32.totalorder %s1016_s19, %s1012_s18 }
  0x12   : > { %s1455_s26 = smov (%p41_p0, %s39_s26), 0  ;;  %p62_p5 = scmp.eq.s32.totalorder %s1106_s24, 0 }
  0x13   : > { %1423 = sst [smem:[#allocation19_spill]] %s1455_s26  ;;  %p1118_p4 = por %p56_p2, %p55_p1 }
  0x14   : > { %s45_s29 = ssub.s32 %s1028_s22, %s1455_s26  ;;  %p197_p6 = scmp.eq.s32.totalorder %s1106_s24, 1 }
  0x15   : > { %p46_p7 = scmp.eq.s32.totalorder %s45_s29, 0  ;;  %p1126_p8 = por %p62_p5, %p61_p3 }
  0x16   : > { %p1130_p9 = por %p197_p6, %p55_p1  ;;  %p203_p10 = scmp.eq.s32.totalorder %s675_s25, 1 }
  0x17   : > { %s1425_s30 = scalar_select %p1126_p8, 1, 0 }
  0x18   : > { %s1426_s6 = scalar_select %p1130_p9, 1, 0 }
  0x19   : > { %s1135_s7 = scalar_select %p46_p7, %s1020_s20, %s48_s27  }
  0x1a   : > { %p1137_p11 = por %p203_p10, %p61_p3  ;;  %p731_p13 = scmp.lt.s32.totalorder %s1032_s23, 2 }
  0x1b   : > { %1427 = sst [smem:[#allocation20_spill]] %s1135_s7  ;;  %s1409_s9 = sand.u32 1, %s1020_s20  }
  0x1c   : > { %s1428_s8 = scalar_select %p1137_p11, 1, 0 }
  0x1d   : > { %s1146_s10 = sshll.u32 %s1409_s9, 3  ;;  %s1149_s11 = sshll.u32 %s1028_s22, 7 }
  0x1e   : > { %p1153_p0 = pnand %p731_p13, %p1118_p4  ;;  %s1411_s13 = sand.u32 1, %s1032_s23  }
  0x1f   : > { %s1430_s1 = sld [smem:[#allocation21_spill]]  ;;  %s246_s17 = scalar_lea.vmem [#allocation6], %s1146_s10 }
  0x20   : > { %s1429_s12 = scalar_select %p1153_p0, 1, 0 }
  0x21   : > { %s254_s25 = sshll.u32 %s246_s17, 4  ;;  %s1171_s27 = scalar_lea.sflag [#allocation7], %s1411_s13  ;;  %s1166_s25 = int_to_ptr.vmem [resolvable:$true] %s254_s25 }
  0x22   : > { %p1177_p4 = pneg %p1153_p0 }
  0x25   : > { %s1162_s16 = scalar_lea.hbm %s1430_s1, %s1149_s11  ;;  %s797_s17 = scalar_lea.hbm %s1430_s1, 256 }
  0x26   : > { %s792_s28 = scalar_lea.hbm %s1162_s16, 128  ;;  %p798_p7 = scmp.lt.u32.totalorder %s1162_s16, %s1430_s1 }
  0x27   : > { %p793_p3 = scmp.ne.s32.totalorder %s1162_s16, %s792_s28  ;;  %p799_p10 = scmp.lt.u32.totalorder %s797_s17, %s792_s28 }
  0x28   : > { %p801_p12 = scmp.lt.u32.totalorder %s792_s28, %s1162_s16 }
  0x29   : > { %p795_p5 = pnand %p1177_p4, %p793_p3  ;;  %p800_p13 = por %p799_p10, %p798_p7 }
  0x2b   : > { %p796_p6 = pneg %p795_p5  ;;  %p802_p1 = por %p801_p12, %p800_p13 }
  0x2d   : > { %p803_p2 = pnand %p802_p1, %p796_p6 }
  0x2f   : > { %806 = shalt.err (!%p803_p2)
}
  0x30   : > { %s807_s13 = scalar_lea.vmem %s1166_s25, 128  ;;  %s1034_s14 = smov [#allocation6]  }
  0x31   : > { %p808_p3 = scmp.ne.s32.totalorder %s1166_s25, %s807_s13  ;;  %s812_s15 = sshll.u32 %s1034_s14, 4  ;;  %s813_s15 = int_to_ptr.vmem [resolvable:$false] %s812_s15 }
  0x32   : > { %s814_s26 = scalar_lea.vmem %s813_s15, 256  ;;  %p815_p9 = scmp.lt.s32.totalorder %s1166_s25, %s813_s15 }
  0x33   : > { %p810_p5 = pnand %p808_p3, %p1177_p4  ;;  %p816_p8 = scmp.lt.s32.totalorder %s814_s26, %s807_s13 }
  0x35   : > { %p811_p11 = pneg %p810_p5  ;;  %p817_p7 = por %p816_p8, %p815_p9 }
  0x37   : > { %p818_p10 = pnand %p817_p7, %p811_p11 }
  0x39   : > { %821 = shalt.err (!%p818_p10)
}
  0x3a   : > { %717 = dma.hbm_to_vmem [thread:$0]  (!%p1153_p0), %s1162_s16, 128, %s1166_s25, %s1171_s27  }
  0x3b   : > { %p1432_p12 = scmp.lt.s32.totalorder %s1032_s23, 3  ;;  %p1433_p1 = scmp.ge.s32.totalorder %s1032_s23, 1 }
  0x3c   : > { %s1435_s3 = sld [smem:[#allocation22_spill]]  ;;  %s284_s14 = scalar_lea.vmem [#allocation9], %s1146_s10 }
  0x3d   : > { %p1205_p2 = pnand %p1433_p1, %p1432_p12  ;;  %s292_s15 = sshll.u32 %s284_s14, 4  ;;  %s293_s15 = int_to_ptr.vmem [resolvable:$true] %s292_s15 }
  0x3e   : > { %s1436_s26 = sand.u32 1, %s1032_s23  }
  0x3f   : > { %s1434_s9 = scalar_select %p1205_p2, 1, 0 }
  0x40   : > { %s1218_s16 = scalar_lea.sflag [#allocation10], %s1436_s26 }
  0x42   : > { %s1213_s17 = scalar_lea.hbm %s1435_s3, %s1149_s11  ;;  %s827_s13 = scalar_lea.hbm %s1435_s3, 256 }
  0x43   : > { %s822_s25 = scalar_lea.hbm %s1213_s17, 128  ;;  %p828_p6 = scmp.lt.u32.totalorder %s1213_s17, %s1435_s3 }
  0x44   : > { %p823_p8 = scmp.ne.s32.totalorder %s1213_s17, %s822_s25  ;;  %p829_p13 = scmp.lt.u32.totalorder %s827_s13, %s822_s25 }
  0x45   : > { %p831_p5 = scmp.lt.u32.totalorder %s822_s25, %s1213_s17 }
  0x46   : > { %p825_p9 = pnand %p823_p8, %p1177_p4  ;;  %p830_p3 = por %p829_p13, %p828_p6 }
  0x48   : > { %p826_p11 = pneg %p825_p9  ;;  %p832_p7 = por %p831_p5, %p830_p3 }
  0x4a   : > { %p833_p10 = pnand %p832_p7, %p826_p11 }
  0x4c   : > { %836 = shalt.err (!%p833_p10)
}
  0x4d   : > { %s837_s14 = scalar_lea.vmem %s293_s15, 128  ;;  %s1035_s26 = smov [#allocation9]  }
  0x4e   : > { %p838_p12 = scmp.ne.s32.totalorder %s293_s15, %s837_s14  ;;  %s842_s23 = sshll.u32 %s1035_s26, 4  ;;  %s843_s23 = int_to_ptr.vmem [resolvable:$false] %s842_s23 }
  0x4f   : > { %s844_s1 = scalar_lea.vmem %s843_s23, 256  ;;  %p845_p9 = scmp.lt.s32.totalorder %s293_s15, %s843_s23 }
  0x50   : > { %p840_p1 = pnand %p838_p12, %p1177_p4  ;;  %p846_p2 = scmp.lt.s32.totalorder %s844_s1, %s837_s14 }
  0x52   : > { %p841_p8 = pneg %p840_p1  ;;  %p847_p0 = por %p846_p2, %p845_p9 }
  0x54   : > { %p848_p6 = pnand %p847_p0, %p841_p8 }
  0x56   : > { %851 = shalt.err (!%p848_p6)
}
  0x57   : > { %p1437_p13 = scmp.ne.s32.totalorder %s1429_s12, 0  ;;  %s1242_s25 = scalar_lea.hbm %s1403_s0, %s1149_s11 }
  0x58   : > { %s227_s23 = scalar_lea.vmem [#allocation3], %s1146_s10  ;;  %s1438_s28 = sand.u32 1, %s1020_s20  }
  0x59   : > { %723 = dma.hbm_to_vmem [thread:$0]  (!%p1437_p13), %s1213_s17, 128, %s293_s15, %s1218_s16  }
  0x5a   : > { %s235_s13 = sshll.u32 %s227_s23, 4  ;;  %s224_s14 = scalar_lea.sflag [#allocation4], %s1438_s28  ;;  %s236_s13 = int_to_ptr.vmem [resolvable:$true] %s235_s13 }
  0x5b   : > { %s852_s26 = scalar_lea.hbm %s1242_s25, 128  ;;  %s857_s1 = scalar_lea.hbm %s1403_s0, 256 }
  0x5c   : > { %p853_p0 = scmp.ne.s32.totalorder %s1242_s25, %s852_s26  ;;  %p858_p3 = scmp.lt.u32.totalorder %s1242_s25, %s1403_s0 }
  0x5d   : > { %p859_p5 = scmp.lt.u32.totalorder %s857_s1, %s852_s26  ;;  %p861_p10 = scmp.lt.u32.totalorder %s852_s26, %s1242_s25 }
  0x5e   : > { %p855_p2 = pnand %p853_p0, %p1177_p4 }
  0x5f   : > { %p860_p7 = por %p859_p5, %p858_p3 }
  0x60   : > { %p856_p11 = pneg %p855_p2 }
  0x61   : > { %p862_p12 = por %p861_p10, %p860_p7 }
  0x63   : > { %p863_p1 = pnand %p862_p12, %p856_p11 }
  0x65   : > { %866 = shalt.err (!%p863_p1)
}
  0x66   : > { %s867_s23 = scalar_lea.vmem %s236_s13, 128  ;;  %s1036_s28 = smov [#allocation3]  }
  0x67   : > { %p868_p8 = scmp.ne.s32.totalorder %s236_s13, %s867_s23  ;;  %s872_s3 = sshll.u32 %s1036_s28, 4  ;;  %s873_s3 = int_to_ptr.vmem [resolvable:$false] %s872_s3 }
  0x68   : > { %s874_s17 = scalar_lea.vmem %s873_s3, 256  ;;  %p875_p0 = scmp.lt.s32.totalorder %s236_s13, %s873_s3 }
  0x69   : > { %p870_p9 = pnand %p868_p8, %p1177_p4  ;;  %p876_p2 = scmp.lt.s32.totalorder %s874_s17, %s867_s23 }
  0x6b   : > { %p871_p6 = pneg %p870_p9  ;;  %p877_p13 = por %p876_p2, %p875_p0 }
  0x6d   : > { %p878_p3 = pnand %p877_p13, %p871_p6 }
  0x6f   : > { %881 = shalt.err (!%p878_p3)
}
  0x70   : > { %p1439_p5 = scmp.ne.s32.totalorder %s1429_s12, 0  ;;  %s1268_s1 = scalar_lea.hbm %s1405_s2, %s1149_s11 }
  0x71   : > { %s265_s3 = scalar_lea.vmem [#allocation8], %s1146_s10  ;;  %s882_s7 = scalar_lea.hbm %s1268_s1, 128 }
  0x72   : > { %714 = dma.hbm_to_vmem [thread:$0]  (!%p1439_p5), %s1242_s25, 128, %s236_s13, %s224_s14  }
  0x73   : > { %s273_s22 = sshll.u32 %s265_s3, 4  ;;  %p883_p13 = scmp.ne.s32.totalorder %s1268_s1, %s882_s7  ;;  %s274_s22 = int_to_ptr.vmem [resolvable:$true] %s273_s22 }
  0x74   : > { %s887_s25 = scalar_lea.hbm %s1405_s2, 256  ;;  %p888_p10 = scmp.lt.u32.totalorder %s1268_s1, %s1405_s2 }
  0x75   : > { %p885_p11 = pnand %p883_p13, %p1177_p4  ;;  %p889_p12 = scmp.lt.u32.totalorder %s887_s25, %s882_s7 }
  0x76   : > { %p891_p8 = scmp.lt.u32.totalorder %s882_s7, %s1268_s1 }
  0x77   : > { %p886_p7 = pneg %p885_p11  ;;  %p890_p1 = por %p889_p12, %p888_p10 }
  0x79   : > { %p892_p9 = por %p891_p8, %p890_p1 }
  0x7b   : > { %p893_p6 = pnand %p892_p9, %p886_p7 }
  0x7d   : > { %896 = shalt.err (!%p893_p6)
}
  0x7e   : > { %s897_s17 = scalar_lea.vmem %s274_s22, 128  ;;  %s1037_s26 = smov [#allocation8]  }
  0x7f   : > { %p898_p0 = scmp.ne.s32.totalorder %s274_s22, %s897_s17  ;;  %s902_s15 = sshll.u32 %s1037_s26, 4  ;;  %s903_s15 = int_to_ptr.vmem [resolvable:$false] %s902_s15 }
  0x80   : > { %s904_s3 = scalar_lea.vmem %s903_s15, 256  ;;  %p905_p13 = scmp.lt.s32.totalorder %s274_s22, %s903_s15 }
  0x81   : > { %p900_p2 = pnand %p898_p0, %p1177_p4  ;;  %p906_p11 = scmp.lt.s32.totalorder %s904_s3, %s897_s17 }
  0x83   : > { %p901_p3 = pneg %p900_p2  ;;  %p907_p5 = por %p906_p11, %p905_p13 }
  0x85   : > { %p908_p10 = pnand %p907_p5, %p901_p3 }
  0x87   : > { %911 = shalt.err (!%p908_p10)
}
  0x88   : > { %p1440_p12 = scmp.ne.s32.totalorder %s1429_s12, 0  ;;  %s1293_s28 = scalar_lea.hbm %s1407_s4, %s1149_s11 }
  0x89   : > { %s303_s25 = scalar_lea.vmem [#allocation11], %s1146_s10  ;;  %s912_s14 = scalar_lea.hbm %s1293_s28, 128 }
  0x8a   : > { %720 = dma.hbm_to_vmem [thread:$0]  (!%p1440_p12), %s1268_s1, 128, %s274_s22, %s1171_s27  }
  0x8b   : > { %s311_s13 = sshll.u32 %s303_s25, 4  ;;  %p913_p5 = scmp.ne.s32.totalorder %s1293_s28, %s912_s14  ;;  %s312_s13 = int_to_ptr.vmem [resolvable:$true] %s311_s13 }
  0x8c   : > { %s917_s27 = scalar_lea.hbm %s1407_s4, 256  ;;  %p918_p8 = scmp.lt.u32.totalorder %s1293_s28, %s1407_s4 }
  0x8d   : > { %p915_p7 = pnand %p913_p5, %p1177_p4  ;;  %p919_p9 = scmp.lt.u32.totalorder %s917_s27, %s912_s14 }
  0x8e   : > { %p921_p0 = scmp.lt.u32.totalorder %s912_s14, %s1293_s28 }
  0x8f   : > { %p916_p1 = pneg %p915_p7  ;;  %p920_p6 = por %p919_p9, %p918_p8 }
  0x91   : > { %p922_p2 = por %p921_p0, %p920_p6 }
  0x93   : > { %p923_p3 = pnand %p922_p2, %p916_p1 }
  0x95   : > { %926 = shalt.err (!%p923_p3)
}
  0x96   : > { %s927_s10 = scalar_lea.vmem %s312_s13, 128  ;;  %s1038_s11 = smov [#allocation11]  }
  0x97   : > { %p928_p13 = scmp.ne.s32.totalorder %s312_s13, %s927_s10  ;;  %s932_s15 = sshll.u32 %s1038_s11, 4  ;;  %s933_s15 = int_to_ptr.vmem [resolvable:$false] %s932_s15 }
  0x98   : > { %s934_s3 = scalar_lea.vmem %s933_s15, 256  ;;  %p935_p5 = scmp.lt.s32.totalorder %s312_s13, %s933_s15 }
  0x99   : > { %p930_p11 = pnand %p928_p13, %p1177_p4  ;;  %p936_p7 = scmp.lt.s32.totalorder %s934_s3, %s927_s10 }
  0x9b   : > { %p931_p10 = pneg %p930_p11  ;;  %p937_p12 = por %p936_p7, %p935_p5 }
  0x9d   : > { %p938_p8 = pnand %p937_p12, %p931_p10 }
  0x9f   : > { %941 = shalt.err (!%p938_p8)
}
  0xa0   : > { %p1441_p9 = scmp.ne.s32.totalorder %s1429_s12, 0  ;;  %p1442_p1 = scmp.ne.s32.totalorder %s1434_s9, 0 }
  0xa1   : > { %s1317_s29 = sand.u32 (!%p1442_p1), 1, %s1016_s19   ;;  %p1443_p4 = scmp.ne.s32.totalorder (!%p1442_p1), %s1425_s30, 0 }
  0xa2   : > { %726 = dma.hbm_to_vmem [thread:$0]  (!%p1441_p9), %s1293_s28, 128, %s312_s13, %s1218_s16  }
  0xa3   : > { %320 = sbr.rel (%p1442_p1) target bundleno = 217 (0xd9), region = 40  ;;  %s1320_s7 = sshll.u32 (!%p1442_p1), %s1317_s29, 3 }
  0xa4   : > { %s323_s23 = scalar_lea.sflag (!%p1442_p1), [#allocation4], %s1317_s29  ;;  %s326_s25 = scalar_lea.vmem (!%p1442_p1), [#allocation3], %s1320_s7 }
  0xaa   : > { %995 = dma.done.wait (%p1443_p4), %s323_s23, 128  }
  0xab   : > { %997 = vsyncadd (%p1443_p4), %s323_s23, 4294967168  ;;  %s331_s12 = sand.u32 1, %s1106_s24   ;;  %s335_s16 = scalar_lea.vmem [#allocation6], %s1320_s7 }
  0xac   : > { %s332_s9 = scalar_lea.sflag [#allocation7], %s331_s12 }
  0xad   : > { %999 = dma.done.wait (%p1443_p4), %s332_s9, 256  }
  0xae   : > { %1001 = vsyncadd (%p1443_p4), %s332_s9, 4294967040  ;;  %s344_s28 = scalar_lea.vmem [#allocation8], %s1320_s7  ;;  %s350_s13 = scalar_lea.sflag [#allocation10], %s331_s12 }
  0xaf   : > { %s353_s14 = scalar_lea.vmem [#allocation9], %s1320_s7 }
  0xb0   : > { %1003 = dma.done.wait (%p1443_p4), %s350_s13, 256  }
  0xb1   : > { %1005 = vsyncadd (%p1443_p4), %s350_s13, 4294967040  ;;  %s697_s24 = smul.u32 40, %s1317_s29  ;;  %v423_v0 = vld [vmem:[%s326_s25] sm:$0xff]  ;;  %s362_s17 = scalar_lea.vmem [#allocation11], %s1320_s7  ;;  %v424_v2 = vld [vmem:[%s335_s16] sm:$0xff]  ;;  %vm1039_vm1 = vmmov 1  }
  0xb2   : > { %v427_v1 = vld [vmem:[%s362_s17] sm:$0xff]  ;;  %v435_v5 = vsub.f32 1.0, %v424_v2  ;;  %vm432_vm3 = vcmp.ge.f32.partialorder %v423_v0, 1.5  ;;  %v1040_v11 = vmov 0.0   ;;  %v426_v19 = vld [vmem:[%s353_s14] sm:$0xff]  ;;  %s698_s26 = smul.u32 640, %s1024_s21 }
  0xb3   : > { %vm428_vm0 = vcmp.lt.f32.partialorder %v427_v1, 1.5  ;;  %v430_v3 = vsub.f32 %v423_v0, %v427_v1  ;;  %v450_v4 = vmax.f32 %v427_v1, 0.1  ;;  %v425_v6 = vld [vmem:[%s344_s28] sm:$0xff]  ;;  %s408_s30 = scalar_lea.vmem [#allocation12], %s697_s24  ;;  %v1041_v26 = vmov 1.0  }
  0xb4   : > { %vm429_vm2 = vmxor %vm428_vm0, %vm1039_vm1  ;;  %v441_v7 = vsub.f32 1.0, %v425_v6  ;;  %s502_s27 = sshll.u32 %s408_s30, 4  ;;  %v443_v27 = vsel %vm428_vm0, 10.0, %v1041_v26  ;;  %s1352_s10 = scalar_lea.hbm %s1408_s5, %s698_s26  ;;  %s1354_s27 = int_to_ptr.vmem [resolvable:$true] %s502_s27 }
  0xb5   : > { %v431_v8 = vmul.f32 %v430_v3, %v430_v3  ;;  %786 = vrcp.f32 %v450_v4  ;;  %v436_v9 = vsel %vm429_vm2, %v424_v2, %v435_v5  ;;  %vm433_vm4 = vmand %vm432_vm3, %vm428_vm0  ;;  %v449_v13 = vand.u32 2147483647, %v430_v3  ;;  %s489_s21 = scalar_lea.sflag [#allocation5], %s1317_s29  ;;  %s942_s11 = scalar_lea.vmem %s1354_s27, 640 }
  0xb6   : > { %788 = vlog2.f32 %v436_v9  ;;  %v442_v10 = vsel %vm428_vm0, %v425_v6, %v441_v7  ;;  %v434_v12 = vsel %vm433_vm4, 1.0, %v1040_v11  ;;  %p943_p12 = scmp.ne.s32.totalorder %s1354_s27, %s942_s11  ;;  %p1444_p6 = scmp.ne.s32.totalorder %s1426_s6, 0 }
  0xb7   : > { %483 = vst [vmem:[%s408_s30] sm:$0xff] %v431_v8  ;;  %790 = vlog2.f32 %v442_v10  ;;  %487 = vst [vmem:[%s408_s30 + $0x20] sm:$0xff] %v434_v12  ;;  %s1042_s15 = smov [#allocation12]  }
  0xb8   : > { %p944_p0 = pnand %p943_p12, %p1444_p6  ;;  %s946_s3 = sshll.u32 %s1042_s15, 4  ;;  %s947_s3 = int_to_ptr.vmem [resolvable:$false] %s946_s3 }
  0xb9   : > { %s948_s7 = scalar_lea.vmem %s947_s3, 1280  ;;  %p949_p3 = scmp.lt.s32.totalorder %s1354_s27, %s947_s3 }
  0xba   : > { %p945_p2 = pneg %p944_p0  ;;  %p950_p13 = scmp.lt.s32.totalorder %s948_s7, %s942_s11 }
  0xbc   : > { %p951_p11 = por %p950_p13, %p949_p3 }
  0xbe   : > { %p952_p10 = pnand %p951_p11, %p945_p2 }
  0xbf   : > { %v787_v14 = vpop.eup %786 }
  0xc0   : > { %v789_v15 = vpop.eup %788  ;;  %v452_v16 = vmul.f32 %v787_v14, %v449_v13 }
  0xc1   : > { %v791_v17 = vpop.eup %790  ;;  %v438_v18 = vmul.f32 0.6931472, %v789_v15 }
  0xc2   : > { %v445_v20 = vmul.f32 0.6931472, %v791_v17  ;;  %v453_v21 = vsub.f32 1.0, %v452_v16 }
  0xc3   : > { %v439_v22 = vmax.f32 %v438_v18, -100.0 }
  0xc4   : > { %v446_v23 = vmax.f32 %v445_v20, -100.0  ;;  %v454_v24 = vsub.f32 %v426_v19, %v453_v21 }
  0xc5   : > { %v440_v25 = vsub.f32 0.0, %v439_v22 }
  0xc6   : > { %v447_v28 = vsub.f32 0.0, %v446_v23  ;;  %v455_v29 = vmul.f32 %v454_v24, %v454_v24 }
  0xc7   : > { %484 = vst [vmem:[%s408_s30 + $0x8] sm:$0xff] %v440_v25 }
  0xc8   : > { %v448_v30 = vmul.f32 %v447_v28, %v443_v27  ;;  %486 = vst [vmem:[%s408_s30 + $0x18] sm:$0xff] %v455_v29 }
  0xca   : > { %485 = vst [vmem:[%s408_s30 + $0x10] sm:$0xff] %v448_v30 }
  0xcb   : > { %955 = shalt.err (!%p952_p10)
}
  0xcc   : > { %s956_s23 = scalar_lea.hbm %s1352_s10, 640  ;;  %s960_s9 = scalar_lea.hbm %s1408_s5, 1280 }
  0xcd   : > { %p957_p5 = scmp.ne.s32.totalorder %s1352_s10, %s956_s23  ;;  %p961_p9 = scmp.lt.u32.totalorder %s1352_s10, %s1408_s5 }
  0xce   : > { %p962_p1 = scmp.lt.u32.totalorder %s960_s9, %s956_s23  ;;  %p964_p12 = scmp.lt.u32.totalorder %s956_s23, %s1352_s10 }
  0xcf   : > { %p958_p7 = pnand %p957_p5, %p1444_p6 }
  0xd0   : > { %p963_p4 = por %p962_p1, %p961_p9 }
  0xd1   : > { %p959_p8 = pneg %p958_p7 }
  0xd2   : > { %p965_p0 = por %p964_p12, %p963_p4 }
  0xd4   : > { %p966_p2 = pnand %p965_p0, %p959_p8 }
  0xd6   : > { %969 = shalt.err (!%p966_p2)
}
  0xd7   : > { %s1043_s13 = smov 128   ;;  %s1044_s14 = smov 8  }
  0xd8   : > { %709 = dma.vmem_to_hbm [thread:$0]  (%p1444_p6), %s1354_s27, 640, %s1352_s10, %s489_s21, %s1043_s13, %s1043_s13, %s1044_s14  }
  0xd9 PF: > { %s1445_s24 = sld [smem:[#allocation18_spill]]  ;;  %s517_s17 = sand.u32 1, %s1012_s18  }
  0xda   : > { %p1446_p3 = scmp.ne.s32.totalorder %s1428_s8, 0  ;;  %s518_s30 = scalar_lea.sflag [#allocation5], %s517_s17 }
  0xdf   : > { %p1447_p13 = scmp.ge.s32.totalorder %s1445_s24, 2 }
  0xe1   : > { %p728_p11 = pnand %p1447_p13, %p1446_p3 }
  0xe3   : > { %1007 = dma.done.wait (!%p728_p11), %s518_s30, 640  }
  0xe4   : > { %1009 = vsyncadd (!%p728_p11), %s518_s30, 4294966656  ;;  %s27_s23 = sadd.s32 1, %s1445_s24   ;;  %s1448_s26 = sld [smem:[#allocation20_spill]] }
  0xe5   : > { %p24_p10 = scmp.ge.s32.totalorder %s27_s23, 4   ;;  %s1449_s21 = sld [smem:[#allocation17_spill]] }
  0xe6   : > { %s1450_s22 = sld [smem:[#allocation19_spill]]  ;;  %s1451_s18 = smov %s1016_s19 }
  0xe7   : > { %s1452_s19 = smov %s1020_s20  ;;  %26 = sbr.rel (!%p24_p10) target bundleno = 13 (0xd), region = 145 }
  0xea   : > { %s1453_s20 = smov %s1448_s26 }
  0xee   :  { %523 = vsyncpa [#allocation4], 1 }
  0xef   :  { %525 = vsyncpa [#allocation4 + $0x1], 1 }
  0xf0   :  { %526 = vsyncpa [#allocation7], 1 }
  0xf1   :  { %528 = vsyncpa [#allocation7 + $0x1], 1 }
  0xf2   :  { %529 = vsyncpa [#allocation10], 1 }
  0xf3   :  { %531 = vsyncpa [#allocation10 + $0x1], 1 }
  0xf4   :  { %532 = vsyncpa [#allocation5], 1 }
  0xf5   :  { %534 = vsyncpa [#allocation5 + $0x1], 1 }

</bundles_post_ra>
